<compile_context>
chip_gen: v7x
topology: tpu7x:2x2x1
jax: 0.10.0
libtpu: 0.0.40
codegen_flags: <defaults>
</compile_context>

<pallas_src>
import functools

import jax
import jax.numpy as jnp
from jax.experimental import pallas as pl
from jax.experimental.pallas import tpu as pltpu


def _round_up(x, m):
    return (x + m - 1) // m * m


def cfair_kernel(x_ref, w1_ref, b1_ref, wh_ref, bh_ref, ws_ref, bs_ref,
                 out_ref, *, num_classes, use_bf16):
    nc = num_classes

    def mm(a, w):
        # MXU matmul, f32 accumulate. Weights already arrive in the matmul
        # dtype (bf16 or f32) from the wrapper; only the f32 intermediate
        # activations need a cast in bf16 mode.
        if use_bf16:
            a = a.astype(jnp.bfloat16)
        return jnp.dot(a, w, preferred_element_type=jnp.float32)

    x = x_ref[...]

    # Backbone fc1 + ReLU: h = relu(fc1(x)).
    h = jnp.maximum(mm(x, w1_ref[...]) + b1_ref[...], 0.0)

    # Fused head: [fc2 | adversary0-fc | adversary1-fc] in a single MXU push.
    head = mm(h, wh_ref[...]) + bh_ref[...]           # (tb, nc + 2*adv), f32

    # Backbone logits stay in f32 (no identity-matmul passthrough, so bf16
    # mode never re-rounds them).
    logits = head[:, :nc]

    # grad_reverse(h) is the identity in the forward pass.

    # Adversary hidden activations: ReLU over the full head; the backbone
    # lanes are multiplied by zero rows in ws_ref, so no slicing is needed.
    act = jnp.maximum(head, 0.0)

    # Block-diagonal sensitive classifiers (zero-padded over backbone lanes):
    # (tb, nc + 2*adv) @ (nc + 2*adv, 4) -> [l00 l01 | l10 l11].
    adv = mm(act, ws_ref[...]) + bs_ref[...]

    # 2-way log-softmax without cross-lane reductions:
    #   log_softmax(l)_0 = -softplus(l1 - l0);  log_softmax(l)_1 = -softplus(l0 - l1)
    def softplus(v):  # numerically stable, pure VPU/EUP
        return jnp.maximum(v, 0.0) + jnp.log1p(jnp.exp(-jnp.abs(v)))

    d0 = adv[:, 0:1] - adv[:, 1:2]
    d1 = adv[:, 2:3] - adv[:, 3:4]

    # Direct lane stores into the packed output slab (no lane concatenate).
    out_ref[:, :nc] = logits
    out_ref[:, nc:nc + 1] = -softplus(-d0)
    out_ref[:, nc + 1:nc + 2] = -softplus(d0)
    out_ref[:, nc + 2:nc + 3] = -softplus(-d1)
    out_ref[:, nc + 3:nc + 4] = -softplus(d1)


def cfair_forward(x, params, num_classes, *, use_bf16=False, tile_b=None):
    """Runs the fused CFairNet_MLP forward kernel.

    Returns (outputs, c0_all, c1_all) where c{j}_all holds the log-softmax
    adversary output for *every* row; row selection by label is done by the
    caller (matches h_relu[labels[:, 0] == j] in the reference).

    Set use_bf16=True on v6e/v7x to halve the HBM x stream (f32 accumulate and
    f32 elementwise math are kept regardless).
    """
    B, in_features = x.shape
    hidden = params["w1"].shape[1]
    adv = params["wa0"].shape[1]
    nc = num_classes
    head_w = nc + 2 * adv
    n_out = nc + 4

    # ---- weight packing (once, outside the kernel) ----
    # Fused head: fc2 + both adversary first layers -> one wide matmul over h.
    wh = jnp.concatenate([params["w2"], params["wa0"], params["wa1"]], axis=1)
    bh = jnp.concatenate([params["b2"], params["ba0"], params["ba1"]], axis=1)
    # Block-diagonal sensitive classifiers, zero-padded over the backbone
    # lanes so relu(head) can feed it directly.
    z_nc = jnp.zeros((nc, 4), params["ws0"].dtype)
    z_a = jnp.zeros((adv, 2), params["ws0"].dtype)
    ws = jnp.concatenate(
        [z_nc,
         jnp.concatenate([params["ws0"], z_a], axis=1),
         jnp.concatenate([z_a, params["ws1"]], axis=1)], axis=0)  # (nc+2*adv, 4)
    bs = jnp.concatenate([params["bs0"], params["bs1"]], axis=1)   # (1, 4)
    w1, b1 = params["w1"], params["b1"]

    mat_dtype = jnp.bfloat16 if use_bf16 else jnp.float32
    in_bytes = 2 if use_bf16 else 4

    # ---- batch tiling: VMEM-budgeted, >= 2 grid steps for multi-TC chips ----
    B8 = _round_up(B, 8)
    if tile_b is None:
        per_row = (2 * in_features * in_bytes        # x tile, double-buffered
                   + 2 * n_out * 4                   # out tile, double-buffered
                   + (hidden + 2 * head_w + 8) * 4)  # f32 intermediates (h, head, act)
        tile_b = max(8, (20 * 1024 * 1024) // per_row)   # ~20 MiB tile budget
    tile_b = min(tile_b, 8192, B8)
    if B8 >= 16:
        # Keep >= 2 grid iterations so "parallel" can shard across 2 TCs (v7x).
        tile_b = min(tile_b, _round_up(B8 // 2, 8))
    tile_b = max(8, (tile_b // 8) * 8)

    B_pad = _round_up(B, tile_b)
    x_pad = x if B_pad == B else jnp.pad(x, ((0, B_pad - B), (0, 0)))

    # bf16 cast in the wrapper so the HBM->VMEM x stream itself is halved.
    x_pad = x_pad.astype(mat_dtype)
    w1m, whm, wsm = (w.astype(mat_dtype) for w in (w1, wh, ws))

    grid = (B_pad // tile_b,)
    batch_map = lambda i: (i, 0)
    const_map = lambda i: (0, 0)   # weights resident in VMEM across all steps

    weights = (w1m, b1, whm, bh, wsm, bs)
    weight_specs = [pl.BlockSpec(w.shape, const_map) for w in weights]

    flops = 2 * B_pad * (in_features * hidden + hidden * head_w + head_w * 4)
    bytes_accessed = (int(x_pad.size) * in_bytes
                      + sum(int(w.size) * w.dtype.itemsize for w in weights)
                      + B_pad * n_out * 4)
    cost = pl.CostEstimate(flops=flops, transcendentals=4 * B_pad,
                           bytes_accessed=int(bytes_accessed))

    kernel = functools.partial(cfair_kernel, num_classes=nc, use_bf16=use_bf16)

    packed = pl.pallas_call(
        kernel,
        out_shape=jax.ShapeDtypeStruct((B_pad, n_out), jnp.float32),
        grid=grid,
        in_specs=[pl.BlockSpec((tile_b, in_features), batch_map)] + weight_specs,
        out_specs=pl.BlockSpec((tile_b, n_out), batch_map),
        compiler_params=pltpu.CompilerParams(
            dimension_semantics=("parallel",),
            vmem_limit_bytes=32 * 1024 * 1024),
        cost_estimate=cost,
    )(x_pad, *weights)

    packed = packed[:B]
    outputs = packed[:, :nc]
    c0_all = packed[:, nc:nc + 2]
    c1_all = packed[:, nc + 2:nc + 4]
    return outputs, c0_all, c1_all


def init_params(key, in_features, hidden_features, num_classes, adversary_size):
    ks = jax.random.split(key, 12)

    def linear(kw, kb, fan_in, fan_out):
        bound = 1.0 / jnp.sqrt(jnp.float32(fan_in))
        w = jax.random.uniform(kw, (fan_in, fan_out), jnp.float32, -bound, bound)
        b = jax.random.uniform(kb, (1, fan_out), jnp.float32, -bound, bound)
        return w, b

    p = {}
    p["w1"], p["b1"] = linear(ks[0], ks[1], in_features, hidden_features)
    p["w2"], p["b2"] = linear(ks[2], ks[3], hidden_features, num_classes)
    p["wa0"], p["ba0"] = linear(ks[4], ks[5], hidden_features, adversary_size)
    p["ws0"], p["bs0"] = linear(ks[6], ks[7], adversary_size, 2)
    p["wa1"], p["ba1"] = linear(ks[8], ks[9], hidden_features, adversary_size)
    p["ws1"], p["bs1"] = linear(ks[10], ks[11], adversary_size, 2)
    return p


if __name__ == "__main__":
    B = 8
    in_features = 32
    hidden_features = 32
    num_classes = 4
    adversary_size = 16

    key = jax.random.PRNGKey(0)
    kx, klab, kp = jax.random.split(key, 3)
    x = jax.random.normal(kx, (B, in_features), jnp.float32)
    labels = jax.random.randint(klab, (B, 1), 0, 2, jnp.int32)
    params = init_params(kp, in_features, hidden_features, num_classes, adversary_size)

    # Plain-JAX reference.
    feat = x @ params["w1"] + params["b1"]
    h = jnp.maximum(feat, 0.0)
    ref_out = h @ params["w2"] + params["b2"]
    a0 = jnp.maximum(h @ params["wa0"] + params["ba0"], 0.0)
    ref_c0 = jax.nn.log_softmax(a0 @ params["ws0"] + params["bs0"], axis=1)
    a1 = jnp.maximum(h @ params["wa1"] + params["ba1"], 0.0)
    ref_c1 = jax.nn.log_softmax(a1 @ params["ws1"] + params["bs1"], axis=1)

    # f32 path: exact check.
    outputs, c0_all, c1_all = cfair_forward(x, params, num_classes, use_bf16=False)
    outputs = jax.block_until_ready(outputs)
    c0_all = jax.block_until_ready(c0_all)
    c1_all = jax.block_until_ready(c1_all)
    assert jnp.allclose(outputs, ref_out, atol=1e-4), "backbone mismatch (f32)"
    assert jnp.allclose(c0_all, ref_c0, atol=1e-4), "adversary-0 mismatch (f32)"
    assert jnp.allclose(c1_all, ref_c1, atol=1e-4), "adversary-1 mismatch (f32)"

    # bf16 path (recommended default on v6e/v7x): loose tolerance.
    outputs_bf, c0_bf, c1_bf = cfair_forward(x, params, num_classes, use_bf16=True)
    outputs_bf = jax.block_until_ready(outputs_bf)
    c0_bf = jax.block_until_ready(c0_bf)
    c1_bf = jax.block_until_ready(c1_bf)
    assert jnp.allclose(outputs_bf, ref_out, atol=7e-2), "backbone mismatch (bf16)"
    assert jnp.allclose(c0_bf, ref_c0, atol=7e-2), "adversary-0 mismatch (bf16)"
    assert jnp.allclose(c1_bf, ref_c1, atol=7e-2), "adversary-1 mismatch (bf16)"

    # Row filtering by label (dynamic-shape selection, done outside the kernel).
    lab = labels[:, 0]
    c_losses = [c0_all[lab == 0], c1_all[lab == 1]]
    assert c_losses[0].shape[1] == 2 and c_losses[1].shape[1] == 2

    print("KERNEL_OK")
</pallas_src>

<mosaic_0001>
module attributes {stable_mosaic.version = 11 : i64} {
  func.func @cfair_kernel(%arg0: i32, %arg1: memref<8x32xf32, #tpu.memory_space<vmem>>, %arg2: memref<32x32xf32, #tpu.memory_space<vmem>>, %arg3: memref<1x32xf32, #tpu.memory_space<vmem>>, %arg4: memref<32x36xf32, #tpu.memory_space<vmem>>, %arg5: memref<1x36xf32, #tpu.memory_space<vmem>>, %arg6: memref<36x4xf32, #tpu.memory_space<vmem>>, %arg7: memref<1x4xf32, #tpu.memory_space<vmem>>, %arg8: memref<8x8xf32, #tpu.memory_space<vmem>>) attributes {dimension_semantics = [#tpu.dimension_semantics<parallel>], iteration_bounds = array<i64: 1>, scalar_prefetch = 0 : i64, scratch_operands = 0 : i64, tpu.core_type = #tpu.core_type<tc>, window_params = [{transform_indices = @transform_0, window_bounds = array<i64: 8, 32>}, {pipeline_mode = #tpu.pipeline_mode<synchronous>, transform_indices = @transform_1, window_bounds = array<i64: 32, 32>}, {pipeline_mode = #tpu.pipeline_mode<synchronous>, transform_indices = @transform_2, window_bounds = array<i64: 1, 32>}, {pipeline_mode = #tpu.pipeline_mode<synchronous>, transform_indices = @transform_3, window_bounds = array<i64: 32, 36>}, {pipeline_mode = #tpu.pipeline_mode<synchronous>, transform_indices = @transform_4, window_bounds = array<i64: 1, 36>}, {pipeline_mode = #tpu.pipeline_mode<synchronous>, transform_indices = @transform_5, window_bounds = array<i64: 36, 4>}, {pipeline_mode = #tpu.pipeline_mode<synchronous>, transform_indices = @transform_6, window_bounds = array<i64: 1, 4>}, {transform_indices = @transform_7, window_bounds = array<i64: 8, 8>}]} {
    %c0 = arith.constant 0 : index
    %c0_0 = arith.constant 0 : index
    %0 = vector.load %arg1[%c0, %c0_0] : memref<8x32xf32, #tpu.memory_space<vmem>>, vector<8x32xf32>
    %c0_1 = arith.constant 0 : index
    %c0_2 = arith.constant 0 : index
    %1 = vector.load %arg2[%c0_1, %c0_2] : memref<32x32xf32, #tpu.memory_space<vmem>>, vector<32x32xf32>
    %cst = arith.constant dense<0.000000e+00> : vector<8x32xf32>
    %2 = tpu.matmul %0, %1, %cst {dimension_numbers = #tpu.dot_dimension_numbers<[1], [0], [0], [1], [0, 0, 1, 1], [], []>} : vector<8x32xf32>, vector<32x32xf32>, vector<8x32xf32> -> vector<8x32xf32>
    %c0_3 = arith.constant 0 : index
    %c0_4 = arith.constant 0 : index
    %3 = vector.load %arg3[%c0_3, %c0_4] : memref<1x32xf32, #tpu.memory_space<vmem>>, vector<1x32xf32>
    %4 = vector.broadcast %3 : vector<1x32xf32> to vector<8x32xf32>
    %5 = arith.addf %2, %4 : vector<8x32xf32>
    %cst_5 = arith.constant 0.000000e+00 : f32
    %6 = vector.broadcast %cst_5 : f32 to vector<8x32xf32>
    %7 = arith.maximumf %5, %6 : vector<8x32xf32>
    %c0_6 = arith.constant 0 : index
    %c0_7 = arith.constant 0 : index
    %8 = vector.load %arg4[%c0_6, %c0_7] : memref<32x36xf32, #tpu.memory_space<vmem>>, vector<32x36xf32>
    %cst_8 = arith.constant dense<0.000000e+00> : vector<8x36xf32>
    %9 = tpu.matmul %7, %8, %cst_8 {dimension_numbers = #tpu.dot_dimension_numbers<[1], [0], [0], [1], [0, 0, 1, 1], [], []>} : vector<8x32xf32>, vector<32x36xf32>, vector<8x36xf32> -> vector<8x36xf32>
    %c0_9 = arith.constant 0 : index
    %c0_10 = arith.constant 0 : index
    %10 = vector.load %arg5[%c0_9, %c0_10] : memref<1x36xf32, #tpu.memory_space<vmem>>, vector<1x36xf32>
    %11 = vector.broadcast %10 : vector<1x36xf32> to vector<8x36xf32>
    %12 = arith.addf %9, %11 : vector<8x36xf32>
    %13 = vector.extract_strided_slice %12 {offsets = [0, 0], sizes = [8, 4], strides = [1, 1]} : vector<8x36xf32> to vector<8x4xf32>
    %cst_11 = arith.constant 0.000000e+00 : f32
    %14 = vector.broadcast %cst_11 : f32 to vector<8x36xf32>
    %15 = arith.maximumf %12, %14 : vector<8x36xf32>
    %c0_12 = arith.constant 0 : index
    %c0_13 = arith.constant 0 : index
    %16 = vector.load %arg6[%c0_12, %c0_13] : memref<36x4xf32, #tpu.memory_space<vmem>>, vector<36x4xf32>
    %cst_14 = arith.constant dense<0.000000e+00> : vector<8x4xf32>
    %17 = tpu.matmul %15, %16, %cst_14 {dimension_numbers = #tpu.dot_dimension_numbers<[1], [0], [0], [1], [0, 0, 1, 1], [], []>} : vector<8x36xf32>, vector<36x4xf32>, vector<8x4xf32> -> vector<8x4xf32>
    %c0_15 = arith.constant 0 : index
    %c0_16 = arith.constant 0 : index
    %18 = vector.load %arg7[%c0_15, %c0_16] : memref<1x4xf32, #tpu.memory_space<vmem>>, vector<1x4xf32>
    %19 = vector.broadcast %18 : vector<1x4xf32> to vector<8x4xf32>
    %20 = arith.addf %17, %19 : vector<8x4xf32>
    %21 = vector.extract_strided_slice %20 {offsets = [0, 0], sizes = [8, 1], strides = [1, 1]} : vector<8x4xf32> to vector<8x1xf32>
    %22 = vector.extract_strided_slice %20 {offsets = [0, 1], sizes = [8, 1], strides = [1, 1]} : vector<8x4xf32> to vector<8x1xf32>
    %23 = arith.subf %21, %22 : vector<8x1xf32>
    %24 = vector.extract_strided_slice %20 {offsets = [0, 2], sizes = [8, 1], strides = [1, 1]} : vector<8x4xf32> to vector<8x1xf32>
    %25 = vector.extract_strided_slice %20 {offsets = [0, 3], sizes = [8, 1], strides = [1, 1]} : vector<8x4xf32> to vector<8x1xf32>
    %26 = arith.subf %24, %25 : vector<8x1xf32>
    %c0_17 = arith.constant 0 : index
    %c0_18 = arith.constant 0 : index
    %27 = vector.load %arg8[%c0_17, %c0_18] : memref<8x8xf32, #tpu.memory_space<vmem>>, vector<8x4xf32>
    tpu.vector_store %arg8[%c0_17, %c0_18], %13 {strides = array<i32>} : memref<8x8xf32, #tpu.memory_space<vmem>>, vector<8x4xf32>,
    %cst_19 = arith.constant 0.000000e+00 : f32
    %28 = vector.broadcast %cst_19 : f32 to vector<8x1xf32>
    %29 = arith.subf %28, %23 : vector<8x1xf32>
    %cst_20 = arith.constant 0.000000e+00 : f32
    %30 = vector.broadcast %cst_20 : f32 to vector<8x1xf32>
    %31 = arith.maximumf %29, %30 : vector<8x1xf32>
    %32 = math.absf %29 : vector<8x1xf32>
    %cst_21 = arith.constant 0.000000e+00 : f32
    %33 = vector.broadcast %cst_21 : f32 to vector<8x1xf32>
    %34 = arith.subf %33, %32 : vector<8x1xf32>
    %35 = math.exp %34 : vector<8x1xf32>
    %36 = math.log1p %35 : vector<8x1xf32>
    %37 = arith.addf %31, %36 : vector<8x1xf32>
    %cst_22 = arith.constant 0.000000e+00 : f32
    %38 = vector.broadcast %cst_22 : f32 to vector<8x1xf32>
    %39 = arith.subf %38, %37 : vector<8x1xf32>
    %c0_23 = arith.constant 0 : index
    %c4 = arith.constant 4 : index
    %40 = vector.load %arg8[%c0_23, %c4] : memref<8x8xf32, #tpu.memory_space<vmem>>, vector<8x1xf32>
    tpu.vector_store %arg8[%c0_23, %c4], %39 {strides = array<i32>} : memref<8x8xf32, #tpu.memory_space<vmem>>, vector<8x1xf32>,
    %cst_24 = arith.constant 0.000000e+00 : f32
    %41 = vector.broadcast %cst_24 : f32 to vector<8x1xf32>
    %42 = arith.maximumf %23, %41 : vector<8x1xf32>
    %43 = math.absf %23 : vector<8x1xf32>
    %cst_25 = arith.constant 0.000000e+00 : f32
    %44 = vector.broadcast %cst_25 : f32 to vector<8x1xf32>
    %45 = arith.subf %44, %43 : vector<8x1xf32>
    %46 = math.exp %45 : vector<8x1xf32>
    %47 = math.log1p %46 : vector<8x1xf32>
    %48 = arith.addf %42, %47 : vector<8x1xf32>
    %cst_26 = arith.constant 0.000000e+00 : f32
    %49 = vector.broadcast %cst_26 : f32 to vector<8x1xf32>
    %50 = arith.subf %49, %48 : vector<8x1xf32>
    %c0_27 = arith.constant 0 : index
    %c5 = arith.constant 5 : index
    %51 = vector.load %arg8[%c0_27, %c5] : memref<8x8xf32, #tpu.memory_space<vmem>>, vector<8x1xf32>
    tpu.vector_store %arg8[%c0_27, %c5], %50 {strides = array<i32>} : memref<8x8xf32, #tpu.memory_space<vmem>>, vector<8x1xf32>,
    %cst_28 = arith.constant 0.000000e+00 : f32
    %52 = vector.broadcast %cst_28 : f32 to vector<8x1xf32>
    %53 = arith.subf %52, %26 : vector<8x1xf32>
    %cst_29 = arith.constant 0.000000e+00 : f32
    %54 = vector.broadcast %cst_29 : f32 to vector<8x1xf32>
    %55 = arith.maximumf %53, %54 : vector<8x1xf32>
    %56 = math.absf %53 : vector<8x1xf32>
    %cst_30 = arith.constant 0.000000e+00 : f32
    %57 = vector.broadcast %cst_30 : f32 to vector<8x1xf32>
    %58 = arith.subf %57, %56 : vector<8x1xf32>
    %59 = math.exp %58 : vector<8x1xf32>
    %60 = math.log1p %59 : vector<8x1xf32>
    %61 = arith.addf %55, %60 : vector<8x1xf32>
    %cst_31 = arith.constant 0.000000e+00 : f32
    %62 = vector.broadcast %cst_31 : f32 to vector<8x1xf32>
    %63 = arith.subf %62, %61 : vector<8x1xf32>
    %c0_32 = arith.constant 0 : index
    %c6 = arith.constant 6 : index
    %64 = vector.load %arg8[%c0_32, %c6] : memref<8x8xf32, #tpu.memory_space<vmem>>, vector<8x1xf32>
    tpu.vector_store %arg8[%c0_32, %c6], %63 {strides = array<i32>} : memref<8x8xf32, #tpu.memory_space<vmem>>, vector<8x1xf32>,
    %cst_33 = arith.constant 0.000000e+00 : f32
    %65 = vector.broadcast %cst_33 : f32 to vector<8x1xf32>
    %66 = arith.maximumf %26, %65 : vector<8x1xf32>
    %67 = math.absf %26 : vector<8x1xf32>
    %cst_34 = arith.constant 0.000000e+00 : f32
    %68 = vector.broadcast %cst_34 : f32 to vector<8x1xf32>
    %69 = arith.subf %68, %67 : vector<8x1xf32>
    %70 = math.exp %69 : vector<8x1xf32>
    %71 = math.log1p %70 : vector<8x1xf32>
    %72 = arith.addf %66, %71 : vector<8x1xf32>
    %cst_35 = arith.constant 0.000000e+00 : f32
    %73 = vector.broadcast %cst_35 : f32 to vector<8x1xf32>
    %74 = arith.subf %73, %72 : vector<8x1xf32>
    %c0_36 = arith.constant 0 : index
    %c7 = arith.constant 7 : index
    %75 = vector.load %arg8[%c0_36, %c7] : memref<8x8xf32, #tpu.memory_space<vmem>>, vector<8x1xf32>
    tpu.vector_store %arg8[%c0_36, %c7], %74 {strides = array<i32>} : memref<8x8xf32, #tpu.memory_space<vmem>>, vector<8x1xf32>,
    return
  }
  func.func @transform_0(%arg0: i32) -> (i32, i32) {
    %c0_i32 = arith.constant 0 : i32
    %c0_i32_0 = arith.constant 0 : i32
    return %arg0, %c0_i32 : i32, i32
  }
  func.func @transform_1(%arg0: i32) -> (i32, i32) {
    %c0_i32 = arith.constant 0 : i32
    %c0_i32_0 = arith.constant 0 : i32
    %c0_i32_1 = arith.constant 0 : i32
    return %c0_i32, %c0_i32_0 : i32, i32
  }
  func.func @transform_2(%arg0: i32) -> (i32, i32) {
    %c0_i32 = arith.constant 0 : i32
    %c0_i32_0 = arith.constant 0 : i32
    %c0_i32_1 = arith.constant 0 : i32
    return %c0_i32, %c0_i32_0 : i32, i32
  }
  func.func @transform_3(%arg0: i32) -> (i32, i32) {
    %c0_i32 = arith.constant 0 : i32
    %c0_i32_0 = arith.constant 0 : i32
    %c0_i32_1 = arith.constant 0 : i32
    return %c0_i32, %c0_i32_0 : i32, i32
  }
  func.func @transform_4(%arg0: i32) -> (i32, i32) {
    %c0_i32 = arith.constant 0 : i32
    %c0_i32_0 = arith.constant 0 : i32
    %c0_i32_1 = arith.constant 0 : i32
    return %c0_i32, %c0_i32_0 : i32, i32
  }
  func.func @transform_5(%arg0: i32) -> (i32, i32) {
    %c0_i32 = arith.constant 0 : i32
    %c0_i32_0 = arith.constant 0 : i32
    %c0_i32_1 = arith.constant 0 : i32
    return %c0_i32, %c0_i32_0 : i32, i32
  }
  func.func @transform_6(%arg0: i32) -> (i32, i32) {
    %c0_i32 = arith.constant 0 : i32
    %c0_i32_0 = arith.constant 0 : i32
    %c0_i32_1 = arith.constant 0 : i32
    return %c0_i32, %c0_i32_0 : i32, i32
  }
  func.func @transform_7(%arg0: i32) -> (i32, i32) {
    %c0_i32 = arith.constant 0 : i32
    %c0_i32_0 = arith.constant 0 : i32
    return %arg0, %c0_i32 : i32, i32
  }
}

</mosaic_0001>

<bundles_post_ra>
// kernel: tpu_custom_call.1
= control target key start
LH: loop header
LB: loop body
LE: loop exit
PB: predicated region body
PF: predicated region fallthrough
CT: control target
= control target key end

     0   :  { %12 = vsyncpa [#allocation3], 0  ;;  %s634_s0 = inlined_call_operand.vmem [shape: f32[8,32], index: 0, kind: input, shape index: {}]   ;;  %s635_s1 = inlined_call_operand.vmem [shape: f32[32,32], index: 1, kind: input, shape index: {}]   ;;  %s636_s2 = inlined_call_operand.vmem [shape: f32[1,32], index: 2, kind: input, shape index: {}]   ;;  %s637_s3 = inlined_call_operand.hbm [shape: f32[32,36], index: 3, kind: input, shape index: {}]   ;;  %s638_s4 = inlined_call_operand.vmem [shape: f32[1,36], index: 4, kind: input, shape index: {}]   ;;  %s639_s5 = inlined_call_operand.vmem [shape: f32[36,4], index: 5, kind: input, shape index: {}]   ;;  %s640_s6 = inlined_call_operand.vmem [shape: f32[1,4], index: 6, kind: input, shape index: {}]   ;;  %s641_s7 = inlined_call_operand.hbm [shape: f32[8,8], index: 7, kind: output, shape index: {}]  }
   0x1   :  { %13 = vsyncpa [#allocation4], 0  ;;  %s516_s24 = smov [#allocation2]   ;;  %s468_s28 = scalar_lea.hbm %s637_s3, 512 }
   0x2   :  { %s25_s25 = sshll.u32 %s516_s24, 4  ;;  %p469_p0 = scmp.ne.s32.totalorder %s637_s3, %s468_s28  ;;  %s26_s25 = int_to_ptr.vmem [resolvable:$true] %s25_s25 }
   0x3   :  { %p472_p1 = scmp.lt.u32.totalorder %s468_s28, %s637_s3 }
   0x5   :  { %p474_p2 = pnand %p472_p1, %p469_p0 }
   0x7   :  { %477 = shalt.err (!%p474_p2)
}
   0x8   :  { %s478_s10 = scalar_lea.vmem %s26_s25, 512  ;;  %p483_p4 = scmp.lt.s32.totalorder %s26_s25, %s26_s25 }
   0x9   :  { %p479_p3 = scmp.ne.s32.totalorder %s26_s25, %s478_s10  ;;  %p484_p5 = scmp.lt.s32.totalorder %s478_s10, %s478_s10 }
   0xb   :  { %p485_p6 = por %p484_p5, %p483_p4 }
   0xd   :  { %p486_p7 = pnand %p485_p6, %p479_p3 }
   0xf   :  { %489 = shalt.err (!%p486_p7)
}
  0x10   :  { %s517_s11 = smov 128   ;;  %s518_s12 = smov 8  }
  0x11   :  { %31 = dma.hbm_to_vmem [thread:$0]  %s637_s3, 512, %s26_s25, [#allocation3], %s517_s11, %s517_s11, %s518_s12  }
  0x12   :  { %512 = dma.done.wait [#allocation3], 512  }
  0x13   :  { %513 = vsyncadd [#allocation3], 4294966784  ;;  %v519_v0 = vmov 0.0|0.0   ;;  %vm520_vm0 = vmmov 0   ;;  %v521_v1 = vmov 0.0   ;;  %v42_v2 = vld [vmem:[%s635_s1] sm:$0xff] }
  0x14   :  { %432 = vmatprep.subr.bf16.mxu1 %v519_v0  ;;  %405 = vmatprep.mubr.msk.f32.mxu1 %vm520_vm0, %v521_v1  ;;  %v43_v3 = vld [vmem:[%s635_s1 + $0x8] sm:$0xff]  ;;  %v44_v4 = vld [vmem:[%s635_s1 + $0x10] sm:$0xff]  ;;  %v45_v6 = vld [vmem:[%s635_s1 + $0x18] sm:$0xff]  ;;  %vm53_vm1 = vcmask 261120   ;;  %vm229_vm2 = vcmask 1043456   ;;  %vm308_vm3 = vcmask 31744  }
  0x15   :  { %444 = vmatprep.subr.bf16.mxu0 %v519_v0  ;;  %429 = vmatprep.mubr.msk.f32.mxu0 %vm520_vm0, %v521_v1  ;;  %v433_v5 = vpack.c.bf16 %v43_v3, %v42_v2  ;;  %v436_v7 = vpack.c.bf16 %v45_v6, %v44_v4  ;;  %v128_v8 = vld [vmem:[#allocation2] sm:$0xff]  ;;  %v129_v9 = vld [vmem:[#allocation2 + $0x8] sm:$0xff]  ;;  %v130_v12 = vld [vmem:[#allocation2 + $0x10] sm:$0xff]  ;;  %vm225_vm4 = vcmask 293888   ;;  %vm331_vm7 = vcmask 39968   ;;  %s525_s14 = smov [#allocation5]  }
  0x16   :  { %v41_v10 = vld [vmem:[%s634_s0] sm:$0xff]  ;;  %v439_v11 = vpack.c.bf16 %v129_v9, %v128_v8  ;;  %v131_v13 = vld [vmem:[#allocation2 + $0x18] sm:$0xff]  ;;  %v214_v16 = vld [vmem:[%s639_s5 + $0x8] sm:$0xff]  ;;  %vm353_vm8 = vcmask 48168   ;;  %s365_s15 = sshll.u32 %s525_s14, 4  ;;  %vm355_vm9 = vcmask 56368   ;;  %s366_s15 = int_to_ptr.vmem [resolvable:$true] %s365_s15 }
  0x17   :  { %434 = vmatpush3.bf16.msra.mxu1 %v433_v5  ;;  %v442_v14 = vpack.c.bf16 %v131_v13, %v130_v12  ;;  %v213_v15 = vld [vmem:[%s639_s5] sm:$0xff]  ;;  %v215_v23 = vld [vmem:[%s639_s5 + $0x10] sm:$0xff]  ;;  %v216_v24 = vld [vmem:[%s639_s5 + $0x18] sm:$0xff]  ;;  %vm357_vm10 = vcmask 64568   ;;  %s490_s16 = scalar_lea.vmem %s366_s15, 128  ;;  %p495_p9 = scmp.lt.s32.totalorder %s366_s15, %s366_s15 }
  0x18   :  { %435 = vmatprep.subr.bf16.mxu1 %v519_v0  ;;  %v445_v17 = vpack.c.bf16 %v214_v16, %v213_v15  ;;  %v374_v18 = vld [vmem:[%s636_s2] ss:$0 sm:$0xff]  ;;  %v448_v25 = vpack.c.bf16 %v216_v24, %v215_v23  ;;  %p491_p8 = scmp.ne.s32.totalorder %s366_s15, %s490_s16  ;;  %p496_p10 = scmp.lt.s32.totalorder %s490_s16, %s490_s16 }
  0x19   :  { %v217_v26 = vld [vmem:[%s639_s5 + $0x20] sm:$0xf]  ;;  %s522_s5 = smov 127  }
  0x1a   :  { %446 = vmatpush3.bf16.msra.mxu0 %v445_v17  ;;  %v376_v27 = vld [vmem:[%s638_s4] ss:$0 sm:$0xff]  ;;  %s523_s4 = smov 5   ;;  %p497_p11 = por %p496_p10, %p495_p9 }
  0x1b   :  { %437 = vmatpush3.bf16.msra.mxu1 %v436_v7  ;;  %447 = vmatprep.subr.bf16.mxu0 %v519_v0  ;;  %v378_v32 = vld [vmem:[%s640_s6] ss:$0 sm:$0xff]  ;;  %s524_s6 = smov 4  }
  0x1c   :  { %438 = vmatprep.subr.bf16.mxu1 %v519_v0  ;;  %p498_p12 = pnand %p497_p11, %p491_p8 }
  0x1e   :  { %406 = vmatmul.mubr.msk.f32.vlgmr.msra.gmra.mrb[0].mxu1 %vm53_vm1, %v41_v10  ;;  %449 = vmatpush3.bf16.msra.mxu0 %v448_v25 }
  0x1f   :  { %440 = vmatpush3.bf16.msra.mxu1 %v439_v11  ;;  %416 = vmatprep.mubr.msk.f32.mxu1 %vm520_vm0, %v521_v1 }
  0x20   :  { %441 = vmatprep.subr.bf16.mxu1 %v519_v0  ;;  %427 = vmatprep.subr.mxu0 %v521_v1 }
  0x22   :  { %428 = vmatpush3.msk.msra.mxu0 %vm229_vm2, %v217_v26 }
  0x23   :  { %443 = vmatpush3.bf16.msra.mxu1 %v442_v14 }
  0xf1   :  { %v123_v19 = vpop.f32.mrb[0].mxu1 }
  0xf2   :  { %v124_v20 = vadd.f32 %v374_v18, %v123_v19  ;;  %v407_v21 = vpop.f32.mrb[1].mxu1 }
  0xf4   :  { %v127_v22 = vmax.f32 %v124_v20, 0.0 }
  0xf6   :  { %417 = vmatmul.mubr.msk.f32.vlgmr.msra.gmra.mrb[2].mxu1 %vm53_vm1, %v127_v22 }
 0x1c9   :  { %v208_v28 = vpop.f32.mrb[2].mxu1 }
 0x1ca   :  { %v209_v29 = vadd.f32 %v376_v27, %v208_v28  ;;  %v418_v30 = vpop.f32.mrb[3].mxu1 }
 0x1cc   :  { %v212_v31 = vmax.f32 %v209_v29, 0.0  ;;  %309 = vst.msk [vmem:[#allocation5] sm:$0xff] %vm308_vm3, %v209_v29 }
 0x1ce   :  { %430 = vmatmul.mubr.msk.f32.vlgmr.msra.gmra.mrb[0].mxu0 %vm225_vm4, %v212_v31 }
 0x2a1   :  { %v299_v33 = vpop.f32.mrb[0].mxu0 }
 0x2a2   :  { %v300_v34 = vadd.f32 %v378_v32, %v299_v33  ;;  %v431_v35 = vpop.f32.mrb[1].mxu0 }
 0x2a4   :  { %304 = vrot.lane.b32.xlu0 %v300_v34, %s522_s5 }
 0x316   :  { %v305_v36 = vpop.permute.xlu0 %304 }
 0x317   :  { %v307_v37 = vsub.f32 %v300_v34, %v305_v36 }
 0x319   :  { %v310_v38 = vsub.f32 0.0, %v307_v37  ;;  %v334_v39 = vand.u32 2147483647, %v307_v37  ;;  %v333_v59 = vmax.f32 %v307_v37, 0.0 }
 0x31b   :  { %v312_v40 = vand.u32 2147483647, %v310_v38  ;;  %v335_v41 = vsub.f32 0.0, %v334_v39  ;;  %v311_v0 = vmax.f32 %v310_v38, 0.0 }
 0x31d   :  { %v313_v42 = vsub.f32 0.0, %v312_v40  ;;  %v336_v43 = vmul.f32 1.442695, %v335_v41 }
 0x31f   :  { %v314_v44 = vmul.f32 1.442695, %v313_v42  ;;  %460 = vpow2.f32 %v336_v43 }
 0x321   :  { %462 = vpow2.f32 %v314_v44 }
 0x329   :  { %v461_v45 = vpop.eup %460 }
 0x32a   :  { %v338_v46 = vadd.f32 1.0, %v461_v45  ;;  %v341_v49 = vmul.f32 -0.5, %v461_v45  ;;  %v344_v52 = vand.u32 2147483647, %v461_v45 }
 0x32b   :  { %v463_v47 = vpop.eup %462 }
 0x32c   :  { %464 = vlog2.f32 %v338_v46  ;;  %v316_v48 = vadd.f32 1.0, %v463_v47  ;;  %v319_v50 = vmul.f32 -0.5, %v463_v47  ;;  %v342_v51 = vadd.f32 1.0, %v341_v49 }
 0x32d   :  { %v322_v55 = vand.u32 2147483647, %v463_v47  ;;  %vm345_vm5 = vcmp.lt.f32.partialorder %v344_v52, 0.0004427343 }
 0x32e   :  { %466 = vlog2.f32 %v316_v48  ;;  %v320_v53 = vadd.f32 1.0, %v319_v50  ;;  %v343_v57 = vmul.f32 %v461_v45, %v342_v51 }
 0x32f   :  { %vm323_vm6 = vcmp.lt.f32.partialorder %v322_v55, 0.0004427343 }
 0x330   :  { %v321_v62 = vmul.f32 %v463_v47, %v320_v53 }
 0x336   :  { %v465_v54 = vpop.eup %464 }
 0x337   :  { %v340_v56 = vmul.f32 0.6931472, %v465_v54 }
 0x338   :  { %v467_v58 = vpop.eup %466 }
 0x339   :  { %v346_v60 = vsel %vm345_vm5, %v343_v57, %v340_v56  ;;  %v318_v61 = vmul.f32 0.6931472, %v467_v58 }
 0x33a   :  { %v347_v63 = vadd.f32 %v346_v60, %v333_v59 }
 0x33b   :  { %v324_v1 = vsel %vm323_vm6, %v321_v62, %v318_v61 }
 0x33c   :  { %v348_v2 = vsub.f32 0.0, %v347_v63  ;;  %v325_v3 = vadd.f32 %v324_v1, %v311_v0 }
 0x33e   :  { %350 = vrot.lane.b32.xlu1 %v348_v2, %s523_s4  ;;  %v326_v4 = vsub.f32 0.0, %v325_v3 }
 0x340   :  { %328 = vrot.lane.b32.xlu0 %v326_v4, %s524_s6 }
 0x3b0   :  { %v351_v6 = vpop.permute.xlu1 %350 }
 0x3b2   :  { %v329_v5 = vpop.permute.xlu0 %328 }
 0x3b3   :  { %332 = vst.msk [vmem:[#allocation5] sm:$0xff] %vm331_vm7, %v329_v5 }
 0x3b4   :  { %354 = vst.msk [vmem:[#allocation5] sm:$0xff] %vm353_vm8, %v351_v6 }
 0x3b5   :  { %356 = vst.msk [vmem:[#allocation5] sm:$0xff] %vm355_vm9, %v329_v5 }
 0x3b6   :  { %358 = vst.msk [vmem:[#allocation5] sm:$0xff] %vm357_vm10, %v351_v6 }
 0x3b7   :  { %501 = shalt.err (!%p498_p12)
}
 0x3b8   :  { %s502_s3 = scalar_lea.hbm %s641_s7, 128 }
 0x3b9   :  { %p503_p13 = scmp.ne.s32.totalorder %s641_s7, %s502_s3  ;;  %p506_p0 = scmp.lt.u32.totalorder %s502_s3, %s641_s7 }
 0x3bb   :  { %p508_p1 = pnand %p506_p0, %p503_p13 }
 0x3bd   :  { %511 = shalt.err (!%p508_p1)
}
 0x3be   :  { %368 = dma.vmem_to_hbm [thread:$0]  %s366_s15, 128, %s641_s7, [#allocation4]  }
 0x3bf   :  { %514 = dma.done.wait [#allocation4], 128  }
 0x3c0   :  { %515 = vsyncadd [#allocation4], 4294967168 }
 0x3c1   :  { %372 = vsyncpa [#allocation3], 1 }
 0x3c2   :  { %373 = vsyncpa [#allocation4], 1 }

</bundles_post_ra>
